<compile_context>
chip_gen: v7x
topology: tpu7x:2x2x1
jax: 0.10.0
libtpu: 0.0.40
codegen_flags: <defaults>
</compile_context>

<pallas_src>
import functools

import jax
import jax.numpy as jnp
from jax.experimental import pallas as pl
from jax.experimental.pallas import tpu as pltpu

EPS = 1e-8


def _cln_kernel(y_ref, gamma_ref, beta_ref, o_ref):
    # y_ref block: (BR, N); gamma/beta block: (1, N)
    y = y_ref[...].astype(jnp.float32)
    n = y.shape[-1]
    inv_n = jnp.float32(1.0 / n)

    # Two-pass moments over the resident tile: mean, then centered SSQ.
    mean = jnp.sum(y, axis=-1, keepdims=True) * inv_n
    yc = y - mean
    var = jnp.sum(yc * yc, axis=-1, keepdims=True) * inv_n

    inv_std = jax.lax.rsqrt(var + EPS)  # EUP slot; accurate (non-approx)

    gamma = gamma_ref[...].astype(jnp.float32)
    beta = beta_ref[...].astype(jnp.float32)
    o_ref[...] = (gamma * (yc * inv_std) + beta).astype(o_ref.dtype)


def _vmem_sizing():
    """Generation-aware (budget_bytes, vmem_limit_bytes)."""
    cap = None
    try:
        cap = pltpu.get_tpu_info().vmem_capacity_bytes
    except Exception:
        cap = None
    if cap is None or cap <= (64 << 20):
        # v7x-class (64 MiB physical) or unknown: be conservative.
        return 26 << 20, 40 << 20
    # v5e / v6e class (128 MiB physical): use the headroom for taller blocks.
    return 48 << 20, 64 << 20


def _round_up(x, m):
    return ((x + m - 1) // m) * m


def _pick_block_rows(rows, n, itemsize, vmem_budget_bytes, pack):
    """Row-tile sized purely from the VMEM budget (no arbitrary cap)."""
    # Per row of the block: double-buffered input + double-buffered output at
    # the input dtype, plus f32 compute temporaries (upcast + centered copy).
    per_row_bytes = (2 * n * itemsize) + (2 * n * itemsize) + (2 * n * 4)
    br = (vmem_budget_bytes // max(per_row_bytes, 1)) // pack * pack
    br = max(pack, int(br))
    # Keep at least 2 balanced grid steps so both TCs on v7x get work.
    if rows >= 2 * pack:
        half = _round_up((rows + 1) // 2, pack)
        br = min(br, half)
    # Never taller than the (pack-rounded) total row count.
    br = min(br, _round_up(rows, pack))
    return int(br)


@functools.partial(jax.jit, static_argnames=("block_rows",))
def channelwise_layer_norm(y, gamma, beta, *, block_rows=None):
    """y: [M, K, N]; gamma, beta: [1, 1, N]. Returns [M, K, N] in y.dtype."""
    M, K, N = y.shape
    R = M * K
    itemsize = jnp.dtype(y.dtype).itemsize
    pack = max(8, 32 // max(itemsize, 1))  # 8 f32, 16 bf16, 32 int8/fp8

    vmem_budget_bytes, vmem_limit_bytes = _vmem_sizing()

    y2 = y.reshape(R, N)
    g2 = gamma.reshape(1, N)
    b2 = beta.reshape(1, N)

    if block_rows is None:
        block_rows = _pick_block_rows(R, N, itemsize, vmem_budget_bytes, pack)

    grid = (pl.cdiv(R, block_rows),)

    cost = pl.CostEstimate(
        flops=8 * R * N,
        transcendentals=R,
        bytes_accessed=2 * R * N * itemsize,
    )

    out2 = pl.pallas_call(
        _cln_kernel,
        out_shape=jax.ShapeDtypeStruct((R, N), y.dtype),
        grid_spec=pl.GridSpec(
            grid=grid,
            in_specs=[
                pl.BlockSpec((block_rows, N), lambda i: (i, 0)),
                pl.BlockSpec((1, N), lambda i: (0, 0)),
                pl.BlockSpec((1, N), lambda i: (0, 0)),
            ],
            out_specs=pl.BlockSpec((block_rows, N), lambda i: (i, 0)),
        ),
        compiler_params=pltpu.CompilerParams(
            dimension_semantics=("parallel",),
            vmem_limit_bytes=vmem_limit_bytes,
        ),
        cost_estimate=cost,
    )(y2, g2, b2)

    return out2.reshape(M, K, N)


def _reference(y, gamma, beta):
    t = y.dtype
    y32 = y.astype(jnp.float32)
    mean = jnp.mean(y32, axis=2, keepdims=True)
    var = jnp.mean((y32 - mean) ** 2, axis=2, keepdims=True)  # unbiased=False
    out = gamma * (y32 - mean) / jnp.sqrt(var + EPS) + beta
    return out.astype(t)


if __name__ == "__main__":
    key = jax.random.PRNGKey(0)
    k_x, k_g, k_b = jax.random.split(key, 3)

    # Small, lane-dense shapes: batch M=2, length K=16, channels N=128.
    M, K, N = 2, 16, 128
    x = jax.random.normal(k_x, (M, K, N), dtype=jnp.float32)

    # Parameters shaped (1, 1, N) as in the module; perturbed from the
    # reset_parameters() values so the affine path is actually exercised.
    gamma = jnp.ones((1, 1, N), jnp.float32) + 0.1 * jax.random.normal(k_g, (1, 1, N), jnp.float32)
    beta = 0.1 * jax.random.normal(k_b, (1, 1, N), jnp.float32)

    out = channelwise_layer_norm(x, gamma, beta)
    out = jax.block_until_ready(out)

    ref = _reference(x, gamma, beta)
    assert out.shape == (M, K, N)
    assert out.dtype == x.dtype
    assert jnp.allclose(out, ref, atol=1e-5, rtol=1e-5), float(jnp.max(jnp.abs(out - ref)))

    print("KERNEL_OK")
</pallas_src>

<mosaic_0001>
module attributes {stable_mosaic.version = 11 : i64} {
  func.func @_cln_kernel(%arg0: i32, %arg1: memref<16x128xf32, #tpu.memory_space<vmem>>, %arg2: memref<1x128xf32, #tpu.memory_space<vmem>>, %arg3: memref<1x128xf32, #tpu.memory_space<vmem>>, %arg4: memref<16x128xf32, #tpu.memory_space<vmem>>) attributes {dimension_semantics = [#tpu.dimension_semantics<parallel>], iteration_bounds = array<i64: 2>, scalar_prefetch = 0 : i64, scratch_operands = 0 : i64, tpu.core_type = #tpu.core_type<tc>, window_params = [{transform_indices = @transform_0, window_bounds = array<i64: 16, 128>}, {pipeline_mode = #tpu.pipeline_mode<synchronous>, transform_indices = @transform_1, window_bounds = array<i64: 1, 128>}, {pipeline_mode = #tpu.pipeline_mode<synchronous>, transform_indices = @transform_2, window_bounds = array<i64: 1, 128>}, {transform_indices = @transform_3, window_bounds = array<i64: 16, 128>}]} {
    %c0 = arith.constant 0 : index
    %c0_0 = arith.constant 0 : index
    %0 = vector.load %arg1[%c0, %c0_0] : memref<16x128xf32, #tpu.memory_space<vmem>>, vector<16x128xf32>
    %cst = arith.constant dense<0.000000e+00> : vector<16xf32>
    %1 = vector.multi_reduction <add>, %0, %cst [1] : vector<16x128xf32> to vector<16xf32>
    %2 = vector.shape_cast %1 : vector<16xf32> to vector<16x1xf32>
    %cst_1 = arith.constant 7.812500e-03 : f32
    %3 = vector.broadcast %cst_1 : f32 to vector<16x1xf32>
    %4 = arith.mulf %2, %3 : vector<16x1xf32>
    %5 = vector.broadcast %4 : vector<16x1xf32> to vector<16x128xf32>
    %6 = arith.subf %0, %5 : vector<16x128xf32>
    %7 = arith.mulf %6, %6 : vector<16x128xf32>
    %cst_2 = arith.constant dense<0.000000e+00> : vector<16xf32>
    %8 = vector.multi_reduction <add>, %7, %cst_2 [1] : vector<16x128xf32> to vector<16xf32>
    %9 = vector.shape_cast %8 : vector<16xf32> to vector<16x1xf32>
    %cst_3 = arith.constant 7.812500e-03 : f32
    %10 = vector.broadcast %cst_3 : f32 to vector<16x1xf32>
    %11 = arith.mulf %9, %10 : vector<16x1xf32>
    %cst_4 = arith.constant 9.99999993E-9 : f32
    %12 = vector.broadcast %cst_4 : f32 to vector<16x1xf32>
    %13 = arith.addf %11, %12 : vector<16x1xf32>
    %14 = math.rsqrt %13 : vector<16x1xf32>
    %c0_5 = arith.constant 0 : index
    %c0_6 = arith.constant 0 : index
    %15 = vector.load %arg2[%c0_5, %c0_6] : memref<1x128xf32, #tpu.memory_space<vmem>>, vector<1x128xf32>
    %c0_7 = arith.constant 0 : index
    %c0_8 = arith.constant 0 : index
    %16 = vector.load %arg3[%c0_7, %c0_8] : memref<1x128xf32, #tpu.memory_space<vmem>>, vector<1x128xf32>
    %17 = vector.broadcast %14 : vector<16x1xf32> to vector<16x128xf32>
    %18 = arith.mulf %6, %17 : vector<16x128xf32>
    %19 = vector.broadcast %15 : vector<1x128xf32> to vector<16x128xf32>
    %20 = arith.mulf %19, %18 : vector<16x128xf32>
    %21 = vector.broadcast %16 : vector<1x128xf32> to vector<16x128xf32>
    %22 = arith.addf %20, %21 : vector<16x128xf32>
    %c0_9 = arith.constant 0 : index
    %c0_10 = arith.constant 0 : index
    %23 = vector.load %arg4[%c0_9, %c0_10] : memref<16x128xf32, #tpu.memory_space<vmem>>, vector<16x128xf32>
    tpu.vector_store %arg4[%c0_9, %c0_10], %22 {strides = array<i32>} : memref<16x128xf32, #tpu.memory_space<vmem>>, vector<16x128xf32>,
    return
  }
  func.func @transform_0(%arg0: i32) -> (i32, i32) {
    %c0_i32 = arith.constant 0 : i32
    %c0_i32_0 = arith.constant 0 : i32
    return %arg0, %c0_i32 : i32, i32
  }
  func.func @transform_1(%arg0: i32) -> (i32, i32) {
    %c0_i32 = arith.constant 0 : i32
    %c0_i32_0 = arith.constant 0 : i32
    %c0_i32_1 = arith.constant 0 : i32
    return %c0_i32, %c0_i32_0 : i32, i32
  }
  func.func @transform_2(%arg0: i32) -> (i32, i32) {
    %c0_i32 = arith.constant 0 : i32
    %c0_i32_0 = arith.constant 0 : i32
    %c0_i32_1 = arith.constant 0 : i32
    return %c0_i32, %c0_i32_0 : i32, i32
  }
  func.func @transform_3(%arg0: i32) -> (i32, i32) {
    %c0_i32 = arith.constant 0 : i32
    %c0_i32_0 = arith.constant 0 : i32
    return %arg0, %c0_i32 : i32, i32
  }
}

</mosaic_0001>

<bundles_post_ra>
// kernel: channelwise_layer_norm.1
= control target key start
LH: loop header
LB: loop body
LE: loop exit
PB: predicated region body
PF: predicated region fallthrough
CT: control target
= control target key end

     0   :  { %8 = vsyncpa [#allocation3], 0  ;;  %s690_s0 = inlined_call_operand.hbm [shape: f32[32,128], index: 0, kind: input, shape index: {}]   ;;  %s691_s1 = inlined_call_operand.vmem [shape: f32[1,128], index: 1, kind: input, shape index: {}]   ;;  %s692_s2 = inlined_call_operand.vmem [shape: f32[1,128], index: 2, kind: input, shape index: {}]   ;;  %s693_s3 = inlined_call_operand.hbm [shape: f32[32,128], index: 3, kind: output, shape index: {}]  }
   0x1   :  { %10 = vsyncpa [#allocation3 + $0x1], 0 }
   0x2   :  { %11 = vsyncpa [#allocation4], 0 }
   0x3   :  { %13 = vsyncpa [#allocation4 + $0x1], 0  ;;  %s518_s12 = smov 0   ;;  %s520_s13 = smov 0  }
   0x4   :  { %s522_s14 = smov 0   ;;  %s524_s15 = smov 0  }
   0x5 LB: > { %s539_s16 = sadd.s32 4294967295, %s490_s15   ;;  %s322_s17 = sadd.s32 4294967294, %s490_s15   ;;  %s490_s15 = sphi %s524_s15, %s706_s15   ;;  %s486_s14 = sphi %s522_s14, %s705_s14   ;;  %s482_s13 = sphi %s520_s13, %s704_s13   ;;  %s478_s12 = sphi %s518_s12, %s703_s12  }
   0x6   : > { %s543_s18 = sadd.s32 1, %s490_s15   ;;  %s26_s19 = sadd.s32 1, %s486_s14 }
   0x7   : > { %s23_s20 = ssub.s32 %s490_s15, %s543_s18  ;;  %p33_p0 = scmp.ne.s32.totalorder %s486_s14, %s482_s13 }
   0x8   : > { %p24_p1 = scmp.eq.s32.totalorder %s23_s20, 0  ;;  %p34_p2 = scmp.eq.s32.totalorder %s490_s15, 0 }
   0x9   : > { %p39_p3 = scmp.ne.s32.totalorder %s482_s13, %s478_s12  ;;  %p40_p4 = scmp.eq.s32.totalorder %s539_s16, 0 }
   0xa   : > { %s555_s21 = scalar_select %p24_p1, %s486_s14, %s26_s19  }
   0xb   : > { %p557_p5 = por %p34_p2, %p33_p0  ;;  %p561_p6 = por %p40_p4, %p39_p3 }
   0xc   : > { %p105_p7 = scmp.eq.s32.totalorder %s539_s16, 1  ;;  %p111_p8 = scmp.eq.s32.totalorder %s322_s17, 1 }
   0xd   : > { %p352_p10 = scmp.lt.s32.totalorder %s490_s15, 2  ;;  %s137_s26 = sand.u32 1, %s486_s14  }
   0xe   : > { %p568_p11 = por %p105_p7, %p33_p0  ;;  %p572_p12 = por %p111_p8, %p39_p3 }
   0xf   : > { %s338_s27 = sshll.u32 %s490_s15, 8  ;;  %s325_s28 = sshll.u32 %s137_s26, 4 }
  0x10   : > { %s697_s24 = scalar_select %p568_p11, 1, 0 }
  0x11   : > { %s698_s25 = scalar_select %p572_p12, 1, 0 }
  0x12   : > { %s581_s4 = scalar_lea.hbm %s690_s0, %s338_s27  ;;  %s141_s5 = scalar_lea.vmem [#allocation2], %s325_s28 }
  0x13   : > { %s148_s6 = sshll.u32 %s141_s5, 4  ;;  %p585_p13 = pnand %p352_p10, %p557_p5  ;;  %s589_s6 = int_to_ptr.vmem [resolvable:$true] %s148_s6 }
  0x14   : > { %s591_s8 = scalar_lea.sflag [#allocation3], %s137_s26  ;;  %s394_s9 = scalar_lea.hbm %s581_s4, 256 }
  0x15   : > { %p395_p0 = scmp.ne.s32.totalorder %s581_s4, %s394_s9  ;;  %p396_p1 = pneg %p585_p13 }
  0x16   : > { %s399_s17 = scalar_lea.hbm %s690_s0, 512  ;;  %p400_p4 = scmp.lt.u32.totalorder %s581_s4, %s690_s0 }
  0x17   : > { %p397_p2 = pnand %p396_p1, %p395_p0  ;;  %p401_p5 = scmp.lt.u32.totalorder %s399_s17, %s394_s9 }
  0x18   : > { %p403_p8 = scmp.lt.u32.totalorder %s394_s9, %s581_s4 }
  0x19   : > { %p398_p3 = pneg %p397_p2  ;;  %p402_p7 = por %p401_p5, %p400_p4 }
  0x1b   : > { %p404_p10 = por %p403_p8, %p402_p7 }
  0x1d   : > { %p405_p9 = pnand %p404_p10, %p398_p3 }
  0x1f   : > { %408 = shalt.err (!%p405_p9)
}
  0x20   : > { %s409_s22 = scalar_lea.vmem %s589_s6, 256  ;;  %s492_s26 = smov [#allocation2]  }
  0x21   : > { %p410_p0 = scmp.ne.s32.totalorder %s589_s6, %s409_s22  ;;  %s414_s27 = sshll.u32 %s492_s26, 4  ;;  %s415_s27 = int_to_ptr.vmem [resolvable:$false] %s414_s27 }
  0x22   : > { %s416_s28 = scalar_lea.vmem %s415_s27, 512  ;;  %p417_p11 = scmp.lt.s32.totalorder %s589_s6, %s415_s27 }
  0x23   : > { %p412_p2 = pnand %p410_p0, %p396_p1  ;;  %p418_p4 = scmp.lt.s32.totalorder %s416_s28, %s409_s22 }
  0x25   : > { %p413_p12 = pneg %p412_p2  ;;  %p419_p5 = por %p418_p4, %p417_p11 }
  0x27   : > { %p420_p7 = pnand %p419_p5, %p413_p12 }
  0x29   : > { %423 = shalt.err (!%p420_p7)
}
  0x2a   : > { %s493_s29 = smov 128   ;;  %s494_s30 = smov 8  }
  0x2b   : > { %347 = dma.hbm_to_vmem [thread:$0]  (!%p585_p13), %s581_s4, 256, %s589_s6, %s591_s8, %s493_s29, %s493_s29, %s494_s30  }
  0x2c   : > { %p328_p9 = scmp.ge.s32.totalorder %s490_s15, 1  ;;  %p156_p1 = scmp.lt.s32.totalorder %s490_s15, 3 }
  0x2e   : > { %p157_p3 = pnand %p328_p9, %p156_p1 }
  0x2f   : > { %s622_s5 = sand.u32 (!%p157_p3), 1, %s482_s13  }
  0x30   : > { %160 = sbr.rel (%p157_p3) target bundleno = 387 (0x183), region = 32  ;;  %s329_s9 = sshll.u32 (!%p157_p3), %s622_s5, 4 }
  0x31   : > { %s163_s10 = scalar_lea.sflag (!%p157_p3), [#allocation3], %s622_s5  ;;  %s166_s11 = scalar_lea.vmem (!%p157_p3), [#allocation2], %s329_s9 }
  0x37   : > { %469 = dma.done.wait (%p561_p6), %s163_s10, 256  }
  0x38   : > { %471 = vsyncadd (%p561_p6), %s163_s10, 4294967040  ;;  %v191_v0 = vld [vmem:[%s166_s11] sm:$0xff]  ;;  %v192_v1 = vld [vmem:[%s166_s11 + $0x8] sm:$0xff]  ;;  %s339_s8 = sshll.u32 %s539_s16, 8  ;;  %s188_s17 = scalar_lea.vmem [#allocation5], %s329_s9 }
  0x39   : > { %193 = vadd.xlane.f32.xlu0 %v191_v0  ;;  %v331_v17 = vld [vmem:[%s691_s1] ss:$0 sm:$0xff]  ;;  %s249_s19 = sshll.u32 %s188_s17, 4  ;;  %s644_s26 = scalar_lea.hbm %s693_s3, %s339_s8  ;;  %s646_s19 = int_to_ptr.vmem [resolvable:$true] %s249_s19 }
  0x3a   : > { %v332_v19 = vld [vmem:[%s692_s2] ss:$0 sm:$0xff]  ;;  %s236_s27 = scalar_lea.sflag [#allocation4], %s622_s5  ;;  %s424_s28 = scalar_lea.vmem %s646_s19, 256 }
  0x3b   : > { %p425_p6 = scmp.ne.s32.totalorder %s646_s19, %s424_s28  ;;  %p700_p11 = scmp.ne.s32.totalorder %s697_s24, 0 }
  0x3c   : > { %s495_s16 = smov [#allocation5]  }
  0x3d   : > { %195 = vadd.xlane.f32.xlu0 %v192_v1  ;;  %p426_p12 = pnand %p425_p6, %p700_p11  ;;  %s428_s29 = sshll.u32 %s495_s16, 4  ;;  %s429_s29 = int_to_ptr.vmem [resolvable:$false] %s428_s29 }
  0x3e   : > { %s430_s30 = scalar_lea.vmem %s429_s29, 512  ;;  %p431_p8 = scmp.lt.s32.totalorder %s646_s19, %s429_s29 }
  0x3f   : > { %p427_p13 = pneg %p426_p12  ;;  %p432_p10 = scmp.lt.s32.totalorder %s430_s30, %s424_s28 }
  0x41   : > { %p433_p0 = por %p432_p10, %p431_p8 }
  0x43   : > { %p434_p2 = pnand %p433_p0, %p427_p13 }
  0xc6   : > { %v194_v2 = vpop.xlane.xlu0 %193 }
  0xc7   : > { %v197_v3 = vmul.f32 0.0078125, %v194_v2 }
  0xc9   : > { %v199_v4 = vsub.f32 %v191_v0, %v197_v3 }
  0xca   : > { %v196_v5 = vpop.xlane.xlu0 %195 }
  0xcb   : > { %v198_v6 = vmul.f32 0.0078125, %v196_v5  ;;  %v201_v7 = vmul.f32 %v199_v4, %v199_v4 }
  0xcd   : > { %v200_v8 = vsub.f32 %v192_v1, %v198_v6  ;;  %203 = vadd.xlane.f32.xlu1 %v201_v7 }
  0xcf   : > { %v202_v9 = vmul.f32 %v200_v8, %v200_v8 }
  0xd1   : > { %205 = vadd.xlane.f32.xlu1 %v202_v9 }
 0x15a   : > { %v204_v10 = vpop.xlane.xlu1 %203 }
 0x15b   : > { %v207_v11 = vmul.f32 0.0078125, %v204_v10 }
 0x15d   : > { %v209_v12 = vadd.f32 1e-08, %v207_v11 }
 0x15e   : > { %v206_v13 = vpop.xlane.xlu1 %205 }
 0x15f   : > { %390 = vrsqrt.f32 %v209_v12  ;;  %v208_v14 = vmul.f32 0.0078125, %v206_v13 }
 0x161   : > { %v210_v15 = vadd.f32 1e-08, %v208_v14 }
 0x163   : > { %392 = vrsqrt.f32 %v210_v15 }
 0x169   : > { %v391_v16 = vpop.eup %390 }
 0x16a   : > { %v215_v18 = vmul.f32 %v391_v16, %v199_v4 }
 0x16c   : > { %v223_v20 = vmul.f32 %v331_v17, %v215_v18 }
 0x16d   : > { %v393_v21 = vpop.eup %392 }
 0x16e   : > { %v231_v22 = vadd.f32 %v332_v19, %v223_v20  ;;  %v216_v23 = vmul.f32 %v393_v21, %v200_v8 }
 0x170   : > { %v224_v24 = vmul.f32 %v331_v17, %v216_v23  ;;  %233 = vst [vmem:[%s188_s17] sm:$0xff] %v231_v22 }
 0x172   : > { %v232_v25 = vadd.f32 %v332_v19, %v224_v24 }
 0x174   : > { %234 = vst [vmem:[%s188_s17 + $0x8] sm:$0xff] %v232_v25 }
 0x175   : > { %437 = shalt.err (!%p434_p2)
}
 0x176   : > { %s438_s9 = scalar_lea.hbm %s644_s26, 256  ;;  %s442_s23 = scalar_lea.hbm %s693_s3, 512 }
 0x177   : > { %p439_p4 = scmp.ne.s32.totalorder %s644_s26, %s438_s9  ;;  %p443_p9 = scmp.lt.u32.totalorder %s644_s26, %s693_s3 }
 0x178   : > { %p444_p1 = scmp.lt.u32.totalorder %s442_s23, %s438_s9  ;;  %p446_p6 = scmp.lt.u32.totalorder %s438_s9, %s644_s26 }
 0x179   : > { %p440_p5 = pnand %p439_p4, %p700_p11 }
 0x17a   : > { %p445_p3 = por %p444_p1, %p443_p9 }
 0x17b   : > { %p441_p7 = pneg %p440_p5 }
 0x17c   : > { %p447_p12 = por %p446_p6, %p445_p3 }
 0x17e   : > { %p448_p13 = pnand %p447_p12, %p441_p7 }
 0x180   : > { %451 = shalt.err (!%p448_p13)
}
 0x181   : > { %s496_s7 = smov 128   ;;  %s497_s8 = smov 8  }
 0x182   : > { %342 = dma.vmem_to_hbm [thread:$0]  (%p700_p11), %s646_s19, 256, %s644_s26, %s236_s27, %s496_s7, %s496_s7, %s497_s8  }
 0x183 PF: > { %s264_s17 = sand.u32 1, %s478_s12   ;;  %p701_p8 = scmp.ne.s32.totalorder %s698_s25, 0 }
 0x184   : > { %p702_p10 = scmp.ge.s32.totalorder %s490_s15, 2  ;;  %s265_s20 = scalar_lea.sflag [#allocation4], %s264_s17 }
 0x186   : > { %p349_p0 = pnand %p702_p10, %p701_p8 }
 0x188   : > { %473 = dma.done.wait (!%p349_p0), %s265_s20, 256  }
 0x189   : > { %475 = vsyncadd (!%p349_p0), %s265_s20, 4294967040  ;;  %p16_p2 = scmp.ge.s32.totalorder %s543_s18, 4   ;;  %s703_s12 = smov %s482_s13 }
 0x18a   : > { %s704_s13 = smov %s486_s14  ;;  %s705_s14 = smov %s555_s21 }
 0x18b   : > { %s706_s15 = smov %s543_s18  ;;  %18 = sbr.rel (!%p16_p2) target bundleno = 5 (0x5), region = 77 }
 0x192   :  { %270 = vsyncpa [#allocation3], 1 }
 0x193   :  { %272 = vsyncpa [#allocation3 + $0x1], 1 }
 0x194   :  { %273 = vsyncpa [#allocation4], 1 }
 0x195   :  { %275 = vsyncpa [#allocation4 + $0x1], 1 }

</bundles_post_ra>
